<compile_context>
chip_gen: v5e
topology: v5e:2x2
jax: 0.10.0
libtpu: 0.0.40
codegen_flags: <defaults>
</compile_context>

<pallas_src>
import jax
import jax.numpy as jnp
from jax.experimental import pallas as pl
from jax.experimental.pallas import tpu as pltpu


# ---------------------------------------------------------------------------
# Kernel
# ---------------------------------------------------------------------------
def highway_kernel(x_ref, w_ref, b_ref, o_ref):
    """One (row-tile, column-tile) step.

    x_ref: (tile_n, Dp)        activations (stream dtype == weight dtype)
    w_ref: (Dp, 2*tile_c)      fused [W1_j | W2_j] column pair
    b_ref: (1, 2*tile_c)       fused [b1_j | b2_j] (f32)
    o_ref: (tile_n, tile_c)    output columns of tile j
    """
    tile_c = o_ref.shape[-1]
    j = pl.program_id(1)

    x = x_ref[...]                                    # (tile_n, Dp)
    # Single fused MXU matmul: (tile_n, Dp) @ (Dp, 2*tile_c) -> f32 accum.
    xw = jnp.dot(x, w_ref[...], preferred_element_type=jnp.float32)
    xw = xw + b_ref[...]                              # (tile_n, 2*tile_c) f32

    h = jnp.maximum(xw[:, :tile_c], 0.0)              # ReLU(x W1_j + b1_j)
    t = jax.nn.sigmoid(xw[:, tile_c:])                # sigmoid(x W2_j + b2_j)

    # Residual slice of x matching this column tile (lane-aligned start).
    col = pl.multiple_of(j * tile_c, 128)
    xs = x_ref[:, pl.ds(col, tile_c)].astype(jnp.float32)

    # out = h*t + x*(1-t)  ==  x + t*(h - x)   (3 VPU ops/elem)
    o_ref[...] = (xs + t * (h - xs)).astype(o_ref.dtype)


# ---------------------------------------------------------------------------
# Helpers
# ---------------------------------------------------------------------------
def _vmem_budget():
    """Usable VMEM budget (bytes) with headroom for compiler scratch."""
    try:
        cap = int(pltpu.get_tpu_info().vmem_capacity_bytes)
    except Exception:
        cap = 64 * 1024 * 1024          # conservative (v7x per-TC size)
    return int(cap * 3 // 4)            # leave ~25% headroom


def prepare_highway_params(w1, b1, w2, b2, *, param_dtype=jnp.bfloat16,
                           max_weight_vmem_bytes=None):
    """Build the fused, lane-padded, column-tiled weight/bias ONCE.

    w1, w2: (D, D) pre-transposed weights (input-dim first, i.e. PyTorch W^T).
    b1, b2: (D,) or (1, D) biases.
    Returns a params dict to pass to highway_apply().
    """
    D_in, D_out = w1.shape
    assert D_in == D_out, "Highway requires input_shape == depth"
    D = D_in
    f32 = jnp.float32
    Dp = pl.cdiv(D, 128) * 128
    bw = jnp.dtype(param_dtype).itemsize

    if max_weight_vmem_bytes is None:
        # Keep the resident weight block to roughly a third of the budget.
        max_weight_vmem_bytes = _vmem_budget() // 3

    # Choose number of column tiles (power of 2, tile_c stays a multiple of 128).
    n_col = 1
    lanes = Dp // 128
    while (Dp * 2 * (Dp // n_col) * bw > max_weight_vmem_bytes
           and lanes % (2 * n_col) == 0):
        n_col *= 2
    tile_c = Dp // n_col

    # Zero-pad (padded lanes -> h = 0, t = 0.5, x = 0 -> out = 0, sliced away).
    w1p = jnp.zeros((Dp, Dp), f32).at[:D, :D].set(w1.astype(f32))
    w2p = jnp.zeros((Dp, Dp), f32).at[:D, :D].set(w2.astype(f32))
    # Interleaved per-column-tile pairs: columns of tile j are [W1_j | W2_j].
    wf = jnp.stack([w1p.reshape(Dp, n_col, tile_c),
                    w2p.reshape(Dp, n_col, tile_c)], axis=2)
    wf = wf.reshape(Dp, 2 * Dp).astype(param_dtype)

    b1p = jnp.zeros((Dp,), f32).at[:D].set(jnp.reshape(b1, (-1,)).astype(f32))
    b2p = jnp.zeros((Dp,), f32).at[:D].set(jnp.reshape(b2, (-1,)).astype(f32))
    bf = jnp.stack([b1p.reshape(n_col, tile_c),
                    b2p.reshape(n_col, tile_c)], axis=1).reshape(1, 2 * Dp)

    return {"w": wf, "b": bf, "D": D, "Dp": Dp, "tile_c": tile_c, "n_col": n_col}


# ---------------------------------------------------------------------------
# Forward
# ---------------------------------------------------------------------------
def highway_apply(x, params, *, tile_n=None):
    """Highway forward using pre-fused params (see prepare_highway_params)."""
    D, Dp = params["D"], params["Dp"]
    tile_c, n_col = params["tile_c"], params["n_col"]
    wf, bf = params["w"], params["b"]

    orig_shape = x.shape
    assert orig_shape[-1] == D, "feature dim mismatch"
    x2 = x.reshape(-1, D)
    N = x2.shape[0]

    out_dtype = x.dtype
    stream_dtype = wf.dtype                 # MXU operand dtype (bf16 default)
    bx = jnp.dtype(stream_dtype).itemsize
    bo = jnp.dtype(out_dtype).itemsize
    bw = bx
    budget = _vmem_budget()

    # ---- row tile selection (always a multiple of 8) ----
    if tile_n is None:
        tile_n = 1024
        w_bufs = 1 if n_col == 1 else 2

        def need(tn):
            return (2 * tn * Dp * bx                     # x stream (double-buffered)
                    + 2 * tn * tile_c * bo               # out stream (double-buffered)
                    + w_bufs * Dp * 2 * tile_c * bw      # fused weight block(s)
                    + 2 * 2 * tile_c * 4                 # bias
                    + 3 * tn * 2 * tile_c * 4)           # f32 intermediates (generous)

        while tile_n > 8 and need(tile_n) > budget:
            tile_n //= 2
    tile_n = max(8, (int(tile_n) // 8) * 8)
    tile_n = min(tile_n, pl.cdiv(N, 8) * 8)
    Np = pl.cdiv(N, tile_n) * tile_n

    # ---- pad / cast x only when required (avoid extra HBM passes) ----
    if Np == N and Dp == D:
        xp = x2 if x2.dtype == stream_dtype else x2.astype(stream_dtype)
    else:
        xp = jnp.zeros((Np, Dp), stream_dtype).at[:N, :D].set(
            x2.astype(stream_dtype))

    grid = (Np // tile_n, n_col)
    resident_w = (n_col == 1)               # weight index_map constant over grid

    ce = pl.CostEstimate(
        flops=4 * Np * Dp * Dp,
        transcendentals=Np * Dp,
        bytes_accessed=int(Np * Dp * bx + Np * Dp * bo
                           + (1 if resident_w else Np // tile_n) * Dp * 2 * Dp * bw
                           + 2 * Dp * 4),
    )

    def run(single_buffer):
        kw = {"pipeline_mode": pl.Buffered(1)} if single_buffer else {}
        in_specs = [
            pl.BlockSpec((tile_n, Dp), lambda i, j: (i, 0)),            # x tiles
            pl.BlockSpec((Dp, 2 * tile_c), lambda i, j: (0, j), **kw),  # fused W
            pl.BlockSpec((1, 2 * tile_c), lambda i, j: (0, j), **kw),   # fused b
        ]
        return pl.pallas_call(
            highway_kernel,
            out_shape=jax.ShapeDtypeStruct((Np, Dp), out_dtype),
            grid_spec=pltpu.PrefetchScalarGridSpec(
                num_scalar_prefetch=0,
                grid=grid,
                in_specs=in_specs,
                out_specs=pl.BlockSpec((tile_n, tile_c), lambda i, j: (i, j)),
            ),
            compiler_params=pltpu.CompilerParams(
                dimension_semantics=("parallel", "arbitrary"),
                vmem_limit_bytes=int(budget),
            ),
            cost_estimate=ce,
        )(xp, wf, bf)

    try:
        out = run(single_buffer=resident_w)
    except Exception:
        # Fallback if this jax build rejects pipeline_mode=pl.Buffered(1).
        out = run(single_buffer=False)

    if Np == N and Dp == D:
        return out.reshape(orig_shape)
    return out[:N, :D].reshape(orig_shape)


def highway(x, w1, b1, w2, b2, *, mxu_dtype=jnp.bfloat16, tile_n=None):
    """Convenience wrapper (fuses params per call; prefer prepare_* + apply)."""
    params = prepare_highway_params(w1, b1, w2, b2, param_dtype=mxu_dtype)
    return highway_apply(x, params, tile_n=tile_n)


def reference_highway(x, w1, b1, w2, b2):
    h = jnp.maximum(x @ w1 + jnp.reshape(b1, (1, -1)), 0.0)
    t = jax.nn.sigmoid(x @ w2 + jnp.reshape(b2, (1, -1)))
    return h * t + x * (1.0 - t)


# ---------------------------------------------------------------------------
# Test
# ---------------------------------------------------------------------------
if __name__ == "__main__":
    # Highway requires input_shape == depth for the residual to be shape-valid.
    batch, seq, hidden = 2, 8, 32
    depth = hidden

    key = jax.random.PRNGKey(0)
    k_x, k_w1, k_b1, k_w2 = jax.random.split(key, 4)

    x = jax.random.normal(k_x, (batch, seq, hidden), dtype=jnp.float32)

    # Deterministic parameter init (mimicking nn.Linear's uniform fan-in init).
    bound = float(1.0 / (hidden ** 0.5))
    # PyTorch stores weight as (depth, input); we pass transposed (input, depth).
    w1 = jax.random.uniform(k_w1, (hidden, depth), minval=-bound, maxval=bound,
                            dtype=jnp.float32)
    b1 = jax.random.uniform(k_b1, (depth,), minval=-bound, maxval=bound,
                            dtype=jnp.float32)
    w2 = jax.random.uniform(k_w2, (hidden, depth), minval=-bound, maxval=bound,
                            dtype=jnp.float32)
    b2 = jnp.full((depth,), -1.0, dtype=jnp.float32)  # nn.init.constant_(bias, -1.0)

    ref = reference_highway(x.reshape(-1, hidden), w1, b1, w2, b2)
    ref = ref.reshape(batch, seq, hidden)

    # 1) Default bf16-MXU path; fused params built once (hoisted out of forward).
    params_bf16 = prepare_highway_params(w1, b1, w2, b2)
    out_bf16 = jax.block_until_ready(highway_apply(x, params_bf16))
    assert out_bf16.shape == (batch, seq, hidden)
    assert jnp.allclose(out_bf16, ref, atol=5e-2, rtol=5e-2), "bf16 path mismatch"

    # 2) f32 path with a tiny row tile to exercise the multi-tile pipelined grid.
    params_f32 = prepare_highway_params(w1, b1, w2, b2, param_dtype=jnp.float32)
    out_f32 = jax.block_until_ready(highway_apply(x, params_f32, tile_n=8))
    assert out_f32.shape == (batch, seq, hidden)
    assert jnp.allclose(out_f32, ref, atol=1e-4, rtol=1e-4), "f32 path mismatch"

    print("KERNEL_OK")
</pallas_src>

<mosaic_0001>
module attributes {stable_mosaic.version = 11 : i64} {
  func.func @highway_kernel(%arg0: i32, %arg1: i32, %arg2: memref<16x128xbf16, #tpu.memory_space<vmem>>, %arg3: memref<128x256xbf16, #tpu.memory_space<vmem>>, %arg4: memref<1x256xf32, #tpu.memory_space<vmem>>, %arg5: memref<16x128xf32, #tpu.memory_space<vmem>>) attributes {dimension_semantics = [#tpu.dimension_semantics<parallel>, #tpu.dimension_semantics<arbitrary>], iteration_bounds = array<i64: 1, 1>, scalar_prefetch = 0 : i64, scratch_operands = 0 : i64, tpu.core_type = #tpu.core_type<tc>, window_params = [{transform_indices = @transform_0, window_bounds = array<i64: 16, 128>}, {pipeline_mode = #tpu.pipeline_mode<synchronous>, transform_indices = @transform_1, window_bounds = array<i64: 128, 256>}, {pipeline_mode = #tpu.pipeline_mode<synchronous>, transform_indices = @transform_2, window_bounds = array<i64: 1, 256>}, {transform_indices = @transform_3, window_bounds = array<i64: 16, 128>}]} {
    %c0 = arith.constant 0 : index
    %c0_0 = arith.constant 0 : index
    %0 = vector.load %arg2[%c0, %c0_0] : memref<16x128xbf16, #tpu.memory_space<vmem>>, vector<16x128xbf16>
    %c0_1 = arith.constant 0 : index
    %c0_2 = arith.constant 0 : index
    %1 = vector.load %arg3[%c0_1, %c0_2] : memref<128x256xbf16, #tpu.memory_space<vmem>>, vector<128x256xbf16>
    %cst = arith.constant dense<0.000000e+00> : vector<16x256xf32>
    %2 = tpu.matmul %0, %1, %cst {dimension_numbers = #tpu.dot_dimension_numbers<[1], [0], [0], [1], [0, 0, 1, 1], [], []>} : vector<16x128xbf16>, vector<128x256xbf16>, vector<16x256xf32> -> vector<16x256xf32>
    %c0_3 = arith.constant 0 : index
    %c0_4 = arith.constant 0 : index
    %3 = vector.load %arg4[%c0_3, %c0_4] : memref<1x256xf32, #tpu.memory_space<vmem>>, vector<1x256xf32>
    %4 = vector.broadcast %3 : vector<1x256xf32> to vector<16x256xf32>
    %5 = arith.addf %2, %4 : vector<16x256xf32>
    %6 = vector.extract_strided_slice %5 {offsets = [0, 0], sizes = [16, 128], strides = [1, 1]} : vector<16x256xf32> to vector<16x128xf32>
    %cst_5 = arith.constant 0.000000e+00 : f32
    %7 = vector.broadcast %cst_5 : f32 to vector<16x128xf32>
    %8 = arith.maximumf %6, %7 : vector<16x128xf32>
    %9 = vector.extract_strided_slice %5 {offsets = [0, 128], sizes = [16, 128], strides = [1, 1]} : vector<16x256xf32> to vector<16x128xf32>
    %10 = arith.negf %9 : vector<16x128xf32>
    %11 = math.exp %10 : vector<16x128xf32>
    %cst_6 = arith.constant 1.000000e+00 : f32
    %12 = vector.broadcast %cst_6 : f32 to vector<16x128xf32>
    %13 = arith.addf %12, %11 : vector<16x128xf32>
    %14 = arith.divf %12, %13 : vector<16x128xf32>
    %c128_i32 = arith.constant 128 : i32
    %15 = arith.muli %arg1, %c128_i32 : i32
    %16 = tpu.assume_multiple %15, 128 : i32
    %c0_7 = arith.constant 0 : index
    %17 = arith.index_cast %16 : i32 to index
    %18 = vector.load %arg2[%c0_7, %17] : memref<16x128xbf16, #tpu.memory_space<vmem>>, vector<16x128xbf16>
    %19 = arith.extf %18 : vector<16x128xbf16> to vector<16x128xf32>
    %20 = arith.subf %8, %19 : vector<16x128xf32>
    %21 = arith.mulf %14, %20 : vector<16x128xf32>
    %22 = arith.addf %19, %21 : vector<16x128xf32>
    %c0_8 = arith.constant 0 : index
    %c0_9 = arith.constant 0 : index
    %23 = vector.load %arg5[%c0_8, %c0_9] : memref<16x128xf32, #tpu.memory_space<vmem>>, vector<16x128xf32>
    tpu.vector_store %arg5[%c0_8, %c0_9], %22 {strides = array<i32>} : memref<16x128xf32, #tpu.memory_space<vmem>>, vector<16x128xf32>,
    return
  }
  func.func @transform_0(%arg0: i32, %arg1: i32) -> (i32, i32) {
    %c0_i32 = arith.constant 0 : i32
    %c0_i32_0 = arith.constant 0 : i32
    return %arg0, %c0_i32 : i32, i32
  }
  func.func @transform_1(%arg0: i32, %arg1: i32) -> (i32, i32) {
    %c0_i32 = arith.constant 0 : i32
    %c0_i32_0 = arith.constant 0 : i32
    return %c0_i32, %arg1 : i32, i32
  }
  func.func @transform_2(%arg0: i32, %arg1: i32) -> (i32, i32) {
    %c0_i32 = arith.constant 0 : i32
    %c0_i32_0 = arith.constant 0 : i32
    return %c0_i32, %arg1 : i32, i32
  }
  func.func @transform_3(%arg0: i32, %arg1: i32) -> (i32, i32) {
    %c0_i32 = arith.constant 0 : i32
    return %arg0, %arg1 : i32, i32
  }
}

module attributes {stable_mosaic.version = 11 : i64} {
  func.func @highway_kernel(%arg0: i32, %arg1: i32, %arg2: memref<16x128xbf16, #tpu.memory_space<vmem>>, %arg3: memref<128x256xbf16, #tpu.memory_space<vmem>>, %arg4: memref<1x256xf32, #tpu.memory_space<vmem>>, %arg5: memref<16x128xf32, #tpu.memory_space<vmem>>) attributes {dimension_semantics = [#tpu.dimension_semantics<parallel>, #tpu.dimension_semantics<arbitrary>], iteration_bounds = array<i64: 1, 1>, scalar_prefetch = 0 : i64, scratch_operands = 0 : i64, tpu.core_type = #tpu.core_type<tc>, window_params = [{transform_indices = @transform_0, window_bounds = array<i64: 16, 128>}, {transform_indices = @transform_1, window_bounds = array<i64: 128, 256>}, {transform_indices = @transform_2, window_bounds = array<i64: 1, 256>}, {transform_indices = @transform_3, window_bounds = array<i64: 16, 128>}]} {
    %c0 = arith.constant 0 : index
    %c0_0 = arith.constant 0 : index
    %0 = vector.load %arg2[%c0, %c0_0] : memref<16x128xbf16, #tpu.memory_space<vmem>>, vector<16x128xbf16>
    %c0_1 = arith.constant 0 : index
    %c0_2 = arith.constant 0 : index
    %1 = vector.load %arg3[%c0_1, %c0_2] : memref<128x256xbf16, #tpu.memory_space<vmem>>, vector<128x256xbf16>
    %cst = arith.constant dense<0.000000e+00> : vector<16x256xf32>
    %2 = tpu.matmul %0, %1, %cst {dimension_numbers = #tpu.dot_dimension_numbers<[1], [0], [0], [1], [0, 0, 1, 1], [], []>} : vector<16x128xbf16>, vector<128x256xbf16>, vector<16x256xf32> -> vector<16x256xf32>
    %c0_3 = arith.constant 0 : index
    %c0_4 = arith.constant 0 : index
    %3 = vector.load %arg4[%c0_3, %c0_4] : memref<1x256xf32, #tpu.memory_space<vmem>>, vector<1x256xf32>
    %4 = vector.broadcast %3 : vector<1x256xf32> to vector<16x256xf32>
    %5 = arith.addf %2, %4 : vector<16x256xf32>
    %6 = vector.extract_strided_slice %5 {offsets = [0, 0], sizes = [16, 128], strides = [1, 1]} : vector<16x256xf32> to vector<16x128xf32>
    %cst_5 = arith.constant 0.000000e+00 : f32
    %7 = vector.broadcast %cst_5 : f32 to vector<16x128xf32>
    %8 = arith.maximumf %6, %7 : vector<16x128xf32>
    %9 = vector.extract_strided_slice %5 {offsets = [0, 128], sizes = [16, 128], strides = [1, 1]} : vector<16x256xf32> to vector<16x128xf32>
    %10 = arith.negf %9 : vector<16x128xf32>
    %11 = math.exp %10 : vector<16x128xf32>
    %cst_6 = arith.constant 1.000000e+00 : f32
    %12 = vector.broadcast %cst_6 : f32 to vector<16x128xf32>
    %13 = arith.addf %12, %11 : vector<16x128xf32>
    %14 = arith.divf %12, %13 : vector<16x128xf32>
    %c128_i32 = arith.constant 128 : i32
    %15 = arith.muli %arg1, %c128_i32 : i32
    %16 = tpu.assume_multiple %15, 128 : i32
    %c0_7 = arith.constant 0 : index
    %17 = arith.index_cast %16 : i32 to index
    %18 = vector.load %arg2[%c0_7, %17] : memref<16x128xbf16, #tpu.memory_space<vmem>>, vector<16x128xbf16>
    %19 = arith.extf %18 : vector<16x128xbf16> to vector<16x128xf32>
    %20 = arith.subf %8, %19 : vector<16x128xf32>
    %21 = arith.mulf %14, %20 : vector<16x128xf32>
    %22 = arith.addf %19, %21 : vector<16x128xf32>
    %c0_8 = arith.constant 0 : index
    %c0_9 = arith.constant 0 : index
    %23 = vector.load %arg5[%c0_8, %c0_9] : memref<16x128xf32, #tpu.memory_space<vmem>>, vector<16x128xf32>
    tpu.vector_store %arg5[%c0_8, %c0_9], %22 {strides = array<i32>} : memref<16x128xf32, #tpu.memory_space<vmem>>, vector<16x128xf32>,
    return
  }
  func.func @transform_0(%arg0: i32, %arg1: i32) -> (i32, i32) {
    %c0_i32 = arith.constant 0 : i32
    %c0_i32_0 = arith.constant 0 : i32
    return %arg0, %c0_i32 : i32, i32
  }
  func.func @transform_1(%arg0: i32, %arg1: i32) -> (i32, i32) {
    %c0_i32 = arith.constant 0 : i32
    %c0_i32_0 = arith.constant 0 : i32
    return %c0_i32, %arg1 : i32, i32
  }
  func.func @transform_2(%arg0: i32, %arg1: i32) -> (i32, i32) {
    %c0_i32 = arith.constant 0 : i32
    %c0_i32_0 = arith.constant 0 : i32
    return %c0_i32, %arg1 : i32, i32
  }
  func.func @transform_3(%arg0: i32, %arg1: i32) -> (i32, i32) {
    %c0_i32 = arith.constant 0 : i32
    return %arg0, %arg1 : i32, i32
  }
}

</mosaic_0001>

<bundles_post_ra>
// kernel: tpu_custom_call.1
= control target key start
LH: loop header
LB: loop body
LE: loop exit
PB: predicated region body
PF: predicated region fallthrough
CT: control target
= control target key end

     0   :  { %8 = vsyncpa [#allocation3], 0  ;;  %s532_s0 = inlined_call_operand.hbm [shape: bf16[16,128], index: 0, kind: input, shape index: {}]   ;;  %s533_s1 = inlined_call_operand.hbm [shape: bf16[128,256], index: 1, kind: input, shape index: {}]   ;;  %s534_s2 = inlined_call_operand.hbm [shape: f32[1,256], index: 2, kind: input, shape index: {}]   ;;  %s535_s3 = inlined_call_operand.hbm [shape: f32[16,128], index: 3, kind: output, shape index: {}]  }
   0x1   :  { %9 = vsyncpa [#allocation6], 0  ;;  %s28_s14 = sshll.u32 %s533_s1, 4  ;;  %s29_s14 = int_to_ptr.hbm [resolvable:$true] %s28_s14 }
   0x2   :  { %10 = vsyncpa [#allocation4], 0  ;;  %s486_s15 = smov [#allocation5]   ;;  %s15_s19 = sshll.u32 %s532_s0, 4  ;;  %s16_s19 = int_to_ptr.hbm [resolvable:$true] %s15_s19 }
   0x3   :  { %s30_s16 = sshll.u32 %s486_s15, 4  ;;  %s487_s20 = smov 128   ;;  %s31_s16 = int_to_ptr.vmem [resolvable:$true] %s30_s16 }
   0x4   :  { %s488_s21 = smov 8   ;;  %s489_s22 = smov [#allocation2]  }
   0x5   :  { %36 = dma.hbm_to_vmem [thread:$0]  %s29_s14, 2048, %s31_s16, [#allocation6], %s487_s20, %s487_s20, %s488_s21  }
   0x6   :  { %s17_s23 = sshll.u32 %s489_s22, 4  ;;  %s490_s1 = smov 64   ;;  %s18_s23 = int_to_ptr.vmem [resolvable:$true] %s17_s23 }
   0x7   :  { %s491_s24 = smov 4   ;;  %s42_s27 = sshll.u32 %s534_s2, 4  ;;  %s43_s27 = int_to_ptr.hbm [resolvable:$true] %s42_s27 }
   0x8   :  { %23 = dma.hbm_to_vmem [thread:$0]  %s16_s19, 128, %s18_s23, [#allocation3], %s490_s1, %s490_s1, %s491_s24  }
   0x9   :  { %s492_s28 = smov [#allocation7]  }
   0xa   :  { %s44_s0 = sshll.u32 %s492_s28, 4  ;;  %s45_s0 = int_to_ptr.vmem [resolvable:$true] %s44_s0 }
   0xb   :  { %47 = dma.hbm_to_vmem [thread:$0]  %s43_s27, 32, %s45_s0, [#allocation6]  }
   0xc   :  { %480 = dma.done.wait [#allocation3], 128  }
   0xd   :  { %481 = vsyncadd [#allocation3], 4294967168 }
   0xe   :  { %482 = dma.done.wait [#allocation6], 2080  }
   0xf   :  { %483 = vsyncadd [#allocation6], 4294965216  ;;  %v362_v0 = vld [vmem:[#allocation5 + $0x74] sm:$0xf]  ;;  %v341_v1 = vld [vmem:[#allocation5 + $0x78] sm:$0xf0] }
  0x10   :  { %v360_v2 = vld [vmem:[#allocation5 + $0x64] sm:$0xf]  ;;  %v344_v3 = vor.u32 %v362_v0, %v341_v1  ;;  %v333_v4 = vld [vmem:[#allocation5 + $0x68] sm:$0xf0]  ;;  %v339_v5 = vld [vmem:[#allocation5 + $0x70] sm:$0xf] }
  0x11   :  { %v336_v6 = vor.u32 %v360_v2, %v333_v4  ;;  %v358_v7 = vld [vmem:[#allocation5 + $0x54] sm:$0xf]  ;;  %v363_v8 = vld [vmem:[#allocation5 + $0x74] sm:$0xf0]  ;;  %v325_v9 = vld [vmem:[#allocation5 + $0x58] sm:$0xf0] }
  0x12   :  { %184 = vmatpush.bf16.msra.mxu1 %v344_v3  ;;  %v340_v10 = vor.u32 %v363_v8, %v339_v5  ;;  %v331_v11 = vld [vmem:[#allocation5 + $0x60] sm:$0xf]  ;;  %v361_v12 = vld [vmem:[#allocation5 + $0x64] sm:$0xf0]  ;;  %v328_v14 = vor.u32 %v358_v7, %v325_v9  ;;  %v323_v15 = vld [vmem:[#allocation5 + $0x50] sm:$0xf] }
  0x13   :  { %v332_v13 = vor.u32 %v361_v12, %v331_v11  ;;  %v359_v16 = vld [vmem:[#allocation5 + $0x54] sm:$0xf0]  ;;  %v356_v17 = vld [vmem:[#allocation5 + $0x44] sm:$0xf]  ;;  %v317_v18 = vld [vmem:[#allocation5 + $0x48] sm:$0xf0] }
  0x14   :  { %170 = vmatpush.bf16.msra.mxu0 %v340_v10  ;;  %v324_v19 = vor.u32 %v359_v16, %v323_v15  ;;  %v320_v20 = vor.u32 %v356_v17, %v317_v18  ;;  %v315_v21 = vld [vmem:[#allocation5 + $0x40] sm:$0xf]  ;;  %v357_v22 = vld [vmem:[#allocation5 + $0x44] sm:$0xf0]  ;;  %v354_v23 = vld [vmem:[#allocation5 + $0x34] sm:$0xf] }
  0x15   :  { %v309_v24 = vld [vmem:[#allocation5 + $0x38] sm:$0xf0]  ;;  %v316_v25 = vor.u32 %v357_v22, %v315_v21  ;;  %v307_v27 = vld [vmem:[#allocation5 + $0x30] sm:$0xf]  ;;  %v355_v28 = vld [vmem:[#allocation5 + $0x34] sm:$0xf0] }
  0x16   :  { %185 = vmatpush.bf16.msra.mxu1 %v336_v6  ;;  %v312_v26 = vor.u32 %v354_v23, %v309_v24  ;;  %v352_v29 = vld [vmem:[#allocation5 + $0x24] sm:$0xf]  ;;  %v301_v30 = vld [vmem:[#allocation5 + $0x28] sm:$0xf0]  ;;  %v308_v31 = vor.u32 %v355_v28, %v307_v27  ;;  %v299_v33 = vld [vmem:[#allocation5 + $0x20] sm:$0xf] }
  0x17   :  { %v304_v32 = vor.u32 %v352_v29, %v301_v30  ;;  %v353_v34 = vld [vmem:[#allocation5 + $0x24] sm:$0xf0]  ;;  %v350_v35 = vld [vmem:[#allocation5 + $0x14] sm:$0xf]  ;;  %v293_v36 = vld [vmem:[#allocation5 + $0x18] sm:$0xf0] }
  0x18   :  { %171 = vmatpush.bf16.msra.mxu0 %v332_v13  ;;  %v300_v37 = vor.u32 %v353_v34, %v299_v33  ;;  %v296_v38 = vor.u32 %v350_v35, %v293_v36  ;;  %v291_v39 = vld [vmem:[#allocation5 + $0x10] sm:$0xf]  ;;  %v351_v40 = vld [vmem:[#allocation5 + $0x14] sm:$0xf0]  ;;  %v348_v41 = vld [vmem:[#allocation5 + $0x4] sm:$0xf] }
  0x19   :  { %v285_v42 = vld [vmem:[#allocation5 + $0x8] sm:$0xf0]  ;;  %v292_v43 = vor.u32 %v351_v40, %v291_v39  ;;  %v283_v45 = vld [vmem:[#allocation5] sm:$0xf]  ;;  %v349_v46 = vld [vmem:[#allocation5 + $0x4] sm:$0xf0] }
  0x1a   :  { %186 = vmatpush.bf16.msra.mxu1 %v328_v14  ;;  %v288_v44 = vor.u32 %v348_v41, %v285_v42  ;;  %v347_v47 = vld [vmem:[#allocation2] sm:$0xff]  ;;  %v284_v48 = vor.u32 %v349_v46, %v283_v45  ;;  %v78_v49 = vld [vmem:[#allocation7] sm:$0x3]  ;;  %s493_s2 = smov [#allocation8]   ;;  %s261_s5 = sshll.u32 %s535_s3, 4  ;;  %s262_s5 = int_to_ptr.hbm [resolvable:$true] %s261_s5 }
  0x1b   :  { %v81_v50 = vperm.slane %v78_v49, 1  ;;  %v80_v59 = vperm.slane %v78_v49, 0  ;;  %v365_v1 = vld [vmem:[#allocation2] sm:$0xff]   ;;  %s259_s29 = sshll.u32 %s493_s2, 4  ;;  %s260_s29 = int_to_ptr.vmem [resolvable:$true] %s259_s29 }
  0x1c   :  { %172 = vmatpush.bf16.msra.mxu0 %v324_v19  ;;  %v366_v5 = vunpack.c.l.bf16 %v365_v1  ;;  %v367_v22 = vunpack.c.h.bf16 %v365_v1 }
  0x1e   :  { %187 = vmatpush.bf16.msra.mxu1 %v320_v20 }
  0x20   :  { %173 = vmatpush.bf16.msra.mxu0 %v316_v25 }
  0x22   :  { %188 = vmatpush.bf16.msra.mxu1 %v312_v26 }
  0x24   :  { %174 = vmatpush.bf16.msra.mxu0 %v308_v31 }
  0x26   :  { %189 = vmatpush.bf16.msra.mxu1 %v304_v32 }
  0x28   :  { %175 = vmatpush.bf16.msra.mxu0 %v300_v37 }
  0x2a   :  { %190 = vmatpush.bf16.msra.mxu1 %v296_v38 }
  0x2c   :  { %176 = vmatpush.bf16.msra.mxu0 %v292_v43 }
  0x2e   :  { %191 = vmatpush.bf16.msra.mxu1 %v288_v44 }
  0x30   :  { %177 = vmatpush.bf16.msra.mxu0 %v284_v48 }
  0x31   :  { %192 = vmatmul.bf16.vlgmr.msra.gmra.mxu1 %v347_v47 }
  0x33   :  { %178 = vmatmul.bf16.vlgmr.msra.gmra.mxu0 %v347_v47 }
  0xae   :  { %v193_v51 = vpop.f32.mrf.mxu1 }
  0xaf   :  { %v194_v52 = vadd.f32 %v193_v51, %v81_v50 }
  0xb0   :  { %v179_v60 = vpop.f32.mrf.mxu0 }
  0xb1   :  { %v345_v53 = vmul.f32 -1.442695, %v194_v52  ;;  %v180_v62 = vadd.f32 %v179_v60, %v80_v59 }
  0xb3   :  { %376 = vpow2.f32 %v345_v53  ;;  %v198_v4 = vmax.f32 %v180_v62, 0.0 }
  0xb5   :  { %v247_v11 = vsub.f32 %v198_v4, %v366_v5 }
  0xb6   :  { %v195_v54 = vpop.f32.mrf.mxu1 }
  0xb7   :  { %v196_v55 = vadd.f32 %v195_v54, %v81_v50 }
  0xb8   :  { %v181_v9 = vpop.f32.mrf.mxu0 }
  0xb9   :  { %v377_v56 = vpop.eup %376  ;;  %v346_v57 = vmul.f32 -1.442695, %v196_v55  ;;  %v182_v14 = vadd.f32 %v181_v9, %v80_v59 }
  0xba   :  { %v206_v58 = vadd.f32 1.0, %v377_v56 }
  0xbb   :  { %378 = vpow2.f32 %v346_v57  ;;  %v199_v20 = vmax.f32 %v182_v14, 0.0 }
  0xbc   :  { %380 = vrcp.f32 %v206_v58  ;;  %v219_v6 = vand.u32 2147483648, %v206_v58  ;;  %v217_v8 = vand.u32 2147483647, %v206_v58  ;;  %vm213_vm1 = vweird.f32 %v206_v58 }
  0xbd   :  { %v248_v29 = vsub.f32 %v199_v20, %v367_v22 }
  0xbe   :  { %v220_v13 = vor.u32 1.1754944e-38, %v219_v6  ;;  %vm218_vm3 = vcmp.eq.f32.partialorder %v217_v8, 8.507059e+37 }
  0xc1   :  { %v379_v61 = vpop.eup %378 }
  0xc2   :  { %v381_v63 = vpop.eup %380  ;;  %v207_v0 = vadd.f32 1.0, %v379_v61 }
  0xc3   :  { %v209_v2 = vmul.f32 %v381_v63, %v206_v58  ;;  %vm214_vm0 = vweird.f32 %v381_v63 }
  0xc4   :  { %382 = vrcp.f32 %v207_v0  ;;  %vm215_vm2 = vmor %vm213_vm1, %vm214_vm0  ;;  %v234_v21 = vand.u32 2147483648, %v207_v0  ;;  %v232_v25 = vand.u32 2147483647, %v207_v0  ;;  %vm228_vm5 = vweird.f32 %v207_v0 }
  0xc5   :  { %v210_v3 = vsub.f32 1.0, %v209_v2 }
  0xc6   :  { %v235_v27 = vor.u32 1.1754944e-38, %v234_v21  ;;  %vm233_vm7 = vcmp.eq.f32.partialorder %v232_v25, 8.507059e+37 }
  0xc7   :  { %v211_v7 = vmul.f32 %v381_v63, %v210_v3 }
  0xc9   :  { %v212_v10 = vadd.f32 %v381_v63, %v211_v7 }
  0xca   :  { %v383_v12 = vpop.eup %382 }
  0xcb   :  { %v224_v15 = vmul.f32 %v383_v12, %v207_v0  ;;  %v216_v16 = vsel %vm215_vm2, %v381_v63, %v212_v10  ;;  %vm229_vm4 = vweird.f32 %v383_v12 }
  0xcc   :  { %v221_v17 = vsel %vm218_vm3, %v220_v13, %v216_v16  ;;  %vm230_vm6 = vmor %vm228_vm5, %vm229_vm4 }
  0xcd   :  { %v225_v18 = vsub.f32 1.0, %v224_v15  ;;  %v249_v19 = vmul.f32 %v247_v11, %v221_v17 }
  0xcf   :  { %v251_v23 = vadd.f32 %v366_v5, %v249_v19  ;;  %v226_v24 = vmul.f32 %v383_v12, %v225_v18 }
  0xd1   :  { %253 = vst [vmem:[#allocation8] sm:$0xff] %v251_v23  ;;  %v227_v26 = vadd.f32 %v383_v12, %v226_v24 }
  0xd3   :  { %v231_v28 = vsel %vm230_vm6, %v383_v12, %v227_v26 }
  0xd4   :  { %v236_v30 = vsel %vm233_vm7, %v235_v27, %v231_v28 }
  0xd5   :  { %v250_v31 = vmul.f32 %v248_v29, %v236_v30 }
  0xd7   :  { %v252_v32 = vadd.f32 %v367_v22, %v250_v31 }
  0xd9   :  { %254 = vst [vmem:[#allocation8 + $0x8] sm:$0xff] %v252_v32 }
  0xda   :  { %267 = dma.vmem_to_hbm [thread:$0]  %s260_s29, 256, %s262_s5, [#allocation4], %s487_s20, %s487_s20, %s488_s21  }
  0xdb   :  { %484 = dma.done.wait [#allocation4], 256  }
  0xdc   :  { %485 = vsyncadd [#allocation4], 4294967040 }
  0xdd   :  { %272 = vsyncpa [#allocation3], 1 }
  0xde   :  { %273 = vsyncpa [#allocation6], 1 }
  0xdf   :  { %274 = vsyncpa [#allocation4], 1 }

// kernel: tpu_custom_call.1
= control target key start
LH: loop header
LB: loop body
LE: loop exit
PB: predicated region body
PF: predicated region fallthrough
CT: control target
= control target key end

     0   :  { %8 = vsyncpa [#allocation3], 0  ;;  %s532_s0 = inlined_call_operand.hbm [shape: bf16[16,128], index: 0, kind: input, shape index: {}]   ;;  %s533_s1 = inlined_call_operand.hbm [shape: bf16[128,256], index: 1, kind: input, shape index: {}]   ;;  %s534_s2 = inlined_call_operand.hbm [shape: f32[1,256], index: 2, kind: input, shape index: {}]   ;;  %s535_s3 = inlined_call_operand.hbm [shape: f32[16,128], index: 3, kind: output, shape index: {}]  }
   0x1   :  { %9 = vsyncpa [#allocation6], 0  ;;  %s28_s14 = sshll.u32 %s533_s1, 4  ;;  %s29_s14 = int_to_ptr.hbm [resolvable:$true] %s28_s14 }
   0x2   :  { %10 = vsyncpa [#allocation4], 0  ;;  %s486_s15 = smov [#allocation5]   ;;  %s15_s19 = sshll.u32 %s532_s0, 4  ;;  %s16_s19 = int_to_ptr.hbm [resolvable:$true] %s15_s19 }
   0x3   :  { %s30_s16 = sshll.u32 %s486_s15, 4  ;;  %s487_s20 = smov 128   ;;  %s31_s16 = int_to_ptr.vmem [resolvable:$true] %s30_s16 }
   0x4   :  { %s488_s21 = smov 8   ;;  %s489_s22 = smov [#allocation2]  }
   0x5   :  { %36 = dma.hbm_to_vmem [thread:$0]  %s29_s14, 2048, %s31_s16, [#allocation6], %s487_s20, %s487_s20, %s488_s21  }
   0x6   :  { %s17_s23 = sshll.u32 %s489_s22, 4  ;;  %s490_s1 = smov 64   ;;  %s18_s23 = int_to_ptr.vmem [resolvable:$true] %s17_s23 }
   0x7   :  { %s491_s24 = smov 4   ;;  %s42_s27 = sshll.u32 %s534_s2, 4  ;;  %s43_s27 = int_to_ptr.hbm [resolvable:$true] %s42_s27 }
   0x8   :  { %23 = dma.hbm_to_vmem [thread:$0]  %s16_s19, 128, %s18_s23, [#allocation3], %s490_s1, %s490_s1, %s491_s24  }
   0x9   :  { %s492_s28 = smov [#allocation7]  }
   0xa   :  { %s44_s0 = sshll.u32 %s492_s28, 4  ;;  %s45_s0 = int_to_ptr.vmem [resolvable:$true] %s44_s0 }
   0xb   :  { %47 = dma.hbm_to_vmem [thread:$0]  %s43_s27, 32, %s45_s0, [#allocation6]  }
   0xc   :  { %480 = dma.done.wait [#allocation3], 128  }
   0xd   :  { %481 = vsyncadd [#allocation3], 4294967168 }
   0xe   :  { %482 = dma.done.wait [#allocation6], 2080  }
   0xf   :  { %483 = vsyncadd [#allocation6], 4294965216  ;;  %v362_v0 = vld [vmem:[#allocation5 + $0x74] sm:$0xf]  ;;  %v341_v1 = vld [vmem:[#allocation5 + $0x78] sm:$0xf0] }
  0x10   :  { %v360_v2 = vld [vmem:[#allocation5 + $0x64] sm:$0xf]  ;;  %v344_v3 = vor.u32 %v362_v0, %v341_v1  ;;  %v333_v4 = vld [vmem:[#allocation5 + $0x68] sm:$0xf0]  ;;  %v339_v5 = vld [vmem:[#allocation5 + $0x70] sm:$0xf] }
  0x11   :  { %v336_v6 = vor.u32 %v360_v2, %v333_v4  ;;  %v358_v7 = vld [vmem:[#allocation5 + $0x54] sm:$0xf]  ;;  %v363_v8 = vld [vmem:[#allocation5 + $0x74] sm:$0xf0]  ;;  %v325_v9 = vld [vmem:[#allocation5 + $0x58] sm:$0xf0] }
  0x12   :  { %184 = vmatpush.bf16.msra.mxu1 %v344_v3  ;;  %v340_v10 = vor.u32 %v363_v8, %v339_v5  ;;  %v331_v11 = vld [vmem:[#allocation5 + $0x60] sm:$0xf]  ;;  %v361_v12 = vld [vmem:[#allocation5 + $0x64] sm:$0xf0]  ;;  %v328_v14 = vor.u32 %v358_v7, %v325_v9  ;;  %v323_v15 = vld [vmem:[#allocation5 + $0x50] sm:$0xf] }
  0x13   :  { %v332_v13 = vor.u32 %v361_v12, %v331_v11  ;;  %v359_v16 = vld [vmem:[#allocation5 + $0x54] sm:$0xf0]  ;;  %v356_v17 = vld [vmem:[#allocation5 + $0x44] sm:$0xf]  ;;  %v317_v18 = vld [vmem:[#allocation5 + $0x48] sm:$0xf0] }
  0x14   :  { %170 = vmatpush.bf16.msra.mxu0 %v340_v10  ;;  %v324_v19 = vor.u32 %v359_v16, %v323_v15  ;;  %v320_v20 = vor.u32 %v356_v17, %v317_v18  ;;  %v315_v21 = vld [vmem:[#allocation5 + $0x40] sm:$0xf]  ;;  %v357_v22 = vld [vmem:[#allocation5 + $0x44] sm:$0xf0]  ;;  %v354_v23 = vld [vmem:[#allocation5 + $0x34] sm:$0xf] }
  0x15   :  { %v309_v24 = vld [vmem:[#allocation5 + $0x38] sm:$0xf0]  ;;  %v316_v25 = vor.u32 %v357_v22, %v315_v21  ;;  %v307_v27 = vld [vmem:[#allocation5 + $0x30] sm:$0xf]  ;;  %v355_v28 = vld [vmem:[#allocation5 + $0x34] sm:$0xf0] }
  0x16   :  { %185 = vmatpush.bf16.msra.mxu1 %v336_v6  ;;  %v312_v26 = vor.u32 %v354_v23, %v309_v24  ;;  %v352_v29 = vld [vmem:[#allocation5 + $0x24] sm:$0xf]  ;;  %v301_v30 = vld [vmem:[#allocation5 + $0x28] sm:$0xf0]  ;;  %v308_v31 = vor.u32 %v355_v28, %v307_v27  ;;  %v299_v33 = vld [vmem:[#allocation5 + $0x20] sm:$0xf] }
  0x17   :  { %v304_v32 = vor.u32 %v352_v29, %v301_v30  ;;  %v353_v34 = vld [vmem:[#allocation5 + $0x24] sm:$0xf0]  ;;  %v350_v35 = vld [vmem:[#allocation5 + $0x14] sm:$0xf]  ;;  %v293_v36 = vld [vmem:[#allocation5 + $0x18] sm:$0xf0] }
  0x18   :  { %171 = vmatpush.bf16.msra.mxu0 %v332_v13  ;;  %v300_v37 = vor.u32 %v353_v34, %v299_v33  ;;  %v296_v38 = vor.u32 %v350_v35, %v293_v36  ;;  %v291_v39 = vld [vmem:[#allocation5 + $0x10] sm:$0xf]  ;;  %v351_v40 = vld [vmem:[#allocation5 + $0x14] sm:$0xf0]  ;;  %v348_v41 = vld [vmem:[#allocation5 + $0x4] sm:$0xf] }
  0x19   :  { %v285_v42 = vld [vmem:[#allocation5 + $0x8] sm:$0xf0]  ;;  %v292_v43 = vor.u32 %v351_v40, %v291_v39  ;;  %v283_v45 = vld [vmem:[#allocation5] sm:$0xf]  ;;  %v349_v46 = vld [vmem:[#allocation5 + $0x4] sm:$0xf0] }
  0x1a   :  { %186 = vmatpush.bf16.msra.mxu1 %v328_v14  ;;  %v288_v44 = vor.u32 %v348_v41, %v285_v42  ;;  %v347_v47 = vld [vmem:[#allocation2] sm:$0xff]  ;;  %v284_v48 = vor.u32 %v349_v46, %v283_v45  ;;  %v78_v49 = vld [vmem:[#allocation7] sm:$0x3]  ;;  %s493_s2 = smov [#allocation8]   ;;  %s261_s5 = sshll.u32 %s535_s3, 4  ;;  %s262_s5 = int_to_ptr.hbm [resolvable:$true] %s261_s5 }
  0x1b   :  { %v81_v50 = vperm.slane %v78_v49, 1  ;;  %v80_v59 = vperm.slane %v78_v49, 0  ;;  %v365_v1 = vld [vmem:[#allocation2] sm:$0xff]   ;;  %s259_s29 = sshll.u32 %s493_s2, 4  ;;  %s260_s29 = int_to_ptr.vmem [resolvable:$true] %s259_s29 }
  0x1c   :  { %172 = vmatpush.bf16.msra.mxu0 %v324_v19  ;;  %v366_v5 = vunpack.c.l.bf16 %v365_v1  ;;  %v367_v22 = vunpack.c.h.bf16 %v365_v1 }
  0x1e   :  { %187 = vmatpush.bf16.msra.mxu1 %v320_v20 }
  0x20   :  { %173 = vmatpush.bf16.msra.mxu0 %v316_v25 }
  0x22   :  { %188 = vmatpush.bf16.msra.mxu1 %v312_v26 }
  0x24   :  { %174 = vmatpush.bf16.msra.mxu0 %v308_v31 }
  0x26   :  { %189 = vmatpush.bf16.msra.mxu1 %v304_v32 }
  0x28   :  { %175 = vmatpush.bf16.msra.mxu0 %v300_v37 }
  0x2a   :  { %190 = vmatpush.bf16.msra.mxu1 %v296_v38 }
  0x2c   :  { %176 = vmatpush.bf16.msra.mxu0 %v292_v43 }
  0x2e   :  { %191 = vmatpush.bf16.msra.mxu1 %v288_v44 }
  0x30   :  { %177 = vmatpush.bf16.msra.mxu0 %v284_v48 }
  0x31   :  { %192 = vmatmul.bf16.vlgmr.msra.gmra.mxu1 %v347_v47 }
  0x33   :  { %178 = vmatmul.bf16.vlgmr.msra.gmra.mxu0 %v347_v47 }
  0xae   :  { %v193_v51 = vpop.f32.mrf.mxu1 }
  0xaf   :  { %v194_v52 = vadd.f32 %v193_v51, %v81_v50 }
  0xb0   :  { %v179_v60 = vpop.f32.mrf.mxu0 }
  0xb1   :  { %v345_v53 = vmul.f32 -1.442695, %v194_v52  ;;  %v180_v62 = vadd.f32 %v179_v60, %v80_v59 }
  0xb3   :  { %376 = vpow2.f32 %v345_v53  ;;  %v198_v4 = vmax.f32 %v180_v62, 0.0 }
  0xb5   :  { %v247_v11 = vsub.f32 %v198_v4, %v366_v5 }
  0xb6   :  { %v195_v54 = vpop.f32.mrf.mxu1 }
  0xb7   :  { %v196_v55 = vadd.f32 %v195_v54, %v81_v50 }
  0xb8   :  { %v181_v9 = vpop.f32.mrf.mxu0 }
  0xb9   :  { %v377_v56 = vpop.eup %376  ;;  %v346_v57 = vmul.f32 -1.442695, %v196_v55  ;;  %v182_v14 = vadd.f32 %v181_v9, %v80_v59 }
  0xba   :  { %v206_v58 = vadd.f32 1.0, %v377_v56 }
  0xbb   :  { %378 = vpow2.f32 %v346_v57  ;;  %v199_v20 = vmax.f32 %v182_v14, 0.0 }
  0xbc   :  { %380 = vrcp.f32 %v206_v58  ;;  %v219_v6 = vand.u32 2147483648, %v206_v58  ;;  %v217_v8 = vand.u32 2147483647, %v206_v58  ;;  %vm213_vm1 = vweird.f32 %v206_v58 }
  0xbd   :  { %v248_v29 = vsub.f32 %v199_v20, %v367_v22 }
  0xbe   :  { %v220_v13 = vor.u32 1.1754944e-38, %v219_v6  ;;  %vm218_vm3 = vcmp.eq.f32.partialorder %v217_v8, 8.507059e+37 }
  0xc1   :  { %v379_v61 = vpop.eup %378 }
  0xc2   :  { %v381_v63 = vpop.eup %380  ;;  %v207_v0 = vadd.f32 1.0, %v379_v61 }
  0xc3   :  { %v209_v2 = vmul.f32 %v381_v63, %v206_v58  ;;  %vm214_vm0 = vweird.f32 %v381_v63 }
  0xc4   :  { %382 = vrcp.f32 %v207_v0  ;;  %vm215_vm2 = vmor %vm213_vm1, %vm214_vm0  ;;  %v234_v21 = vand.u32 2147483648, %v207_v0  ;;  %v232_v25 = vand.u32 2147483647, %v207_v0  ;;  %vm228_vm5 = vweird.f32 %v207_v0 }
  0xc5   :  { %v210_v3 = vsub.f32 1.0, %v209_v2 }
  0xc6   :  { %v235_v27 = vor.u32 1.1754944e-38, %v234_v21  ;;  %vm233_vm7 = vcmp.eq.f32.partialorder %v232_v25, 8.507059e+37 }
  0xc7   :  { %v211_v7 = vmul.f32 %v381_v63, %v210_v3 }
  0xc9   :  { %v212_v10 = vadd.f32 %v381_v63, %v211_v7 }
  0xca   :  { %v383_v12 = vpop.eup %382 }
  0xcb   :  { %v224_v15 = vmul.f32 %v383_v12, %v207_v0  ;;  %v216_v16 = vsel %vm215_vm2, %v381_v63, %v212_v10  ;;  %vm229_vm4 = vweird.f32 %v383_v12 }
  0xcc   :  { %v221_v17 = vsel %vm218_vm3, %v220_v13, %v216_v16  ;;  %vm230_vm6 = vmor %vm228_vm5, %vm229_vm4 }
  0xcd   :  { %v225_v18 = vsub.f32 1.0, %v224_v15  ;;  %v249_v19 = vmul.f32 %v247_v11, %v221_v17 }
  0xcf   :  { %v251_v23 = vadd.f32 %v366_v5, %v249_v19  ;;  %v226_v24 = vmul.f32 %v383_v12, %v225_v18 }
  0xd1   :  { %253 = vst [vmem:[#allocation8] sm:$0xff] %v251_v23  ;;  %v227_v26 = vadd.f32 %v383_v12, %v226_v24 }
  0xd3   :  { %v231_v28 = vsel %vm230_vm6, %v383_v12, %v227_v26 }
  0xd4   :  { %v236_v30 = vsel %vm233_vm7, %v235_v27, %v231_v28 }
  0xd5   :  { %v250_v31 = vmul.f32 %v248_v29, %v236_v30 }
  0xd7   :  { %v252_v32 = vadd.f32 %v367_v22, %v250_v31 }
  0xd9   :  { %254 = vst [vmem:[#allocation8 + $0x8] sm:$0xff] %v252_v32 }
  0xda   :  { %267 = dma.vmem_to_hbm [thread:$0]  %s260_s29, 256, %s262_s5, [#allocation4], %s487_s20, %s487_s20, %s488_s21  }
  0xdb   :  { %484 = dma.done.wait [#allocation4], 256  }
  0xdc   :  { %485 = vsyncadd [#allocation4], 4294967040 }
  0xdd   :  { %272 = vsyncpa [#allocation3], 1 }
  0xde   :  { %273 = vsyncpa [#allocation6], 1 }
  0xdf   :  { %274 = vsyncpa [#allocation4], 1 }

</bundles_post_ra>
